<compile_context>
chip_gen: v5e
topology: v5e:2x2
jax: 0.10.0
libtpu: 0.0.40
codegen_flags: <defaults>
</compile_context>

<pallas_src>
import functools

import jax
import jax.numpy as jnp
from jax.experimental import pallas as pl
from jax.experimental.pallas import tpu as pltpu


def _round_up(x, m):
    return (x + m - 1) // m * m


def mlp_mean_kernel(x_ref, w1_ref, b1_ref, w2_ref, b2_ref, w3t_ref, b3_ref,
                    mean_t_ref):
    """One batch tile of mean_net; output emitted transposed as (ac_dim, tile_b)."""
    mxu_dt = w1_ref.dtype  # bf16 fast path; casts are no-ops when weights are f32

    # Hidden layer 1: Linear + tanh (f32 accumulation, f32 elementwise)
    h = jnp.tanh(
        jnp.dot(x_ref[...].astype(mxu_dt), w1_ref[...],
                preferred_element_type=jnp.float32)
        + b1_ref[...]
    )
    # Hidden layer 2: Linear + tanh
    h = jnp.tanh(
        jnp.dot(h.astype(mxu_dt), w2_ref[...],
                preferred_element_type=jnp.float32)
        + b2_ref[...]
    )
    # Output layer (identity activation), produced transposed:
    #   mean_t[a, b] = sum_s w3t[a, s] * h[b, s]   ->  (ac_dim, tile_b) lane-dense store
    mean_t_ref[...] = (
        jax.lax.dot_general(
            w3t_ref[...], h.astype(mxu_dt),
            dimension_numbers=(((1,), (1,)), ((), ())),   # contract feature dims (A @ B.T)
            preferred_element_type=jnp.float32)
        + b3_ref[...]
    )


def mlp_policy_forward(obs, params, *, tile_b=1024, use_bf16_mxu=True):
    """Returns (batch_mean, scale_tril) — the tensors parameterizing
    MultivariateNormal(batch_mean, scale_tril=scale_tril.repeat(B, 1, 1)).

    scale_tril is returned un-broadcast (ac_dim, ac_dim): expanding it to
    (B, ac_dim, ac_dim) in HBM would be pure redundant writes for large B.
    """
    w1, b1, w2, b2, w3t, b3, logstd = params
    B, ob_dim = obs.shape
    size = w1.shape[1]
    ac_dim = w3t.shape[0]

    # ---- batch tiling (pad rows so the grid divides evenly) ----
    tb = min(tile_b, _round_up(B, 8))
    b_pad = _round_up(B, tb)
    if b_pad != B:
        obs = jnp.pad(obs, ((0, b_pad - B), (0, 0)))
    grid = (b_pad // tb,)

    # ---- parameter layouts for the kernel ----
    mxu_dt = jnp.bfloat16 if use_bf16_mxu else jnp.float32
    w1_k = w1.astype(mxu_dt)                               # (ob_dim, size)
    w2_k = w2.astype(mxu_dt)                               # (size, size)
    w3t_k = w3t.astype(mxu_dt)                             # (ac_dim, size)  PyTorch (out, in) layout
    b1_k = b1.reshape(1, size).astype(jnp.float32)
    b2_k = b2.reshape(1, size).astype(jnp.float32)
    b3_k = b3.reshape(ac_dim, 1).astype(jnp.float32)       # column vector for (ac_dim, tb) output

    const = lambda shape: pl.BlockSpec(shape, lambda i: tuple(0 for _ in shape))
    # NOTE: the constant-index weight blocks could use pipeline_mode=pl.Buffered(1) to
    # skip their second pipeline buffer; omitted because the weights are tiny here.

    mean_t = pl.pallas_call(
        mlp_mean_kernel,
        out_shape=jax.ShapeDtypeStruct((ac_dim, b_pad), jnp.float32),
        grid_spec=pltpu.PrefetchScalarGridSpec(
            num_scalar_prefetch=0,
            grid=grid,
            in_specs=[
                pl.BlockSpec((tb, ob_dim), lambda i: (i, 0)),   # obs tile
                const((ob_dim, size)),                          # w1
                const((1, size)),                               # b1
                const((size, size)),                            # w2
                const((1, size)),                               # b2
                const((ac_dim, size)),                          # w3 (out, in)
                const((ac_dim, 1)),                             # b3 (column)
            ],
            out_specs=pl.BlockSpec((ac_dim, tb), lambda i: (0, i)),   # lane-dense mean^T
        ),
        compiler_params=pltpu.CompilerParams(
            dimension_semantics=("parallel",),        # batch tiles are fully independent
            vmem_limit_bytes=48 * 1024 * 1024,        # explicit scoped-VMEM budget (< v7x 64 MiB)
        ),
    )(obs, w1_k, b1_k, w2_k, b2_k, w3t_k, b3_k)

    # Restore the module's (B, ac_dim) layout; consumers that accept (ac_dim, B) can use
    # mean_t directly and skip this transpose.
    batch_mean = mean_t[:, :B].T

    # scale_tril = diag(exp(logstd)) — 4x4 and batch-independent: plain JAX, not a kernel.
    scale_tril = jnp.diag(jnp.exp(logstd.astype(jnp.float32)))

    # TODO(synk): the MultivariateNormal / Categorical distribution objects themselves
    # (and .sample()) are wrappers with no kernel analog; batch_scale_tril is just
    # scale_tril broadcast to (B, ac_dim, ac_dim) and should be expanded lazily downstream.
    return batch_mean, scale_tril


def init_params(key, ob_dim, ac_dim, size):
    """Deterministic synthetic init; shapes match build_mlp(ob_dim, ac_dim, n_layers=2, size)."""
    k1, k2, k3 = jax.random.split(key, 3)
    w1 = jax.random.normal(k1, (ob_dim, size), jnp.float32) * 0.1    # (in, out)
    b1 = jnp.zeros((size,), jnp.float32)
    w2 = jax.random.normal(k2, (size, size), jnp.float32) * 0.1      # (in, out)
    b2 = jnp.zeros((size,), jnp.float32)
    w3t = jax.random.normal(k3, (ac_dim, size), jnp.float32) * 0.1   # (out, in)
    b3 = jnp.zeros((ac_dim,), jnp.float32)
    logstd = jnp.zeros((ac_dim,), jnp.float32)                       # nn.Parameter(torch.zeros(ac_dim))
    return (w1, b1, w2, b2, w3t, b3, logstd)


def reference_forward(obs, params, *, use_bf16_mxu=True):
    w1, b1, w2, b2, w3t, b3, logstd = params
    dt = jnp.bfloat16 if use_bf16_mxu else jnp.float32
    c = lambda a: a.astype(dt)
    h = jnp.tanh(jnp.dot(c(obs), c(w1), preferred_element_type=jnp.float32) + b1[None, :])
    h = jnp.tanh(jnp.dot(c(h), c(w2), preferred_element_type=jnp.float32) + b2[None, :])
    mean = jnp.dot(c(h), c(w3t).T, preferred_element_type=jnp.float32) + b3[None, :]
    scale_tril = jnp.diag(jnp.exp(logstd))
    return mean, scale_tril


if __name__ == "__main__":
    # Small shapes consistent with the module: batch=8, ob_dim=16, n_layers=2, size=32, ac_dim=4
    B, OB_DIM, SIZE, AC_DIM = 8, 16, 32, 4

    key = jax.random.PRNGKey(0)
    k_obs, k_params = jax.random.split(key)
    obs = jax.random.normal(k_obs, (B, OB_DIM), jnp.float32)
    params = init_params(k_params, OB_DIM, AC_DIM, SIZE)

    fwd = jax.jit(functools.partial(mlp_policy_forward, tile_b=1024, use_bf16_mxu=True))
    batch_mean, scale_tril = fwd(obs, params)
    jax.block_until_ready((batch_mean, scale_tril))

    ref_mean, ref_scale = reference_forward(obs, params, use_bf16_mxu=True)
    assert batch_mean.shape == (B, AC_DIM)
    assert scale_tril.shape == (AC_DIM, AC_DIM)
    assert jnp.allclose(batch_mean, ref_mean, atol=1e-3, rtol=1e-3)
    assert jnp.allclose(scale_tril, ref_scale, atol=1e-6, rtol=1e-6)
    # batch_scale_tril is just this broadcast (checked here, never materialized inside jit):
    assert jnp.allclose(jnp.broadcast_to(scale_tril, (B, AC_DIM, AC_DIM))[B - 1], ref_scale)

    print("KERNEL_OK")
</pallas_src>

<mosaic_0001>
module attributes {stable_mosaic.version = 11 : i64} {
  func.func @mlp_mean_kernel(%arg0: i32, %arg1: memref<8x16xf32, #tpu.memory_space<vmem>>, %arg2: memref<16x32xbf16, #tpu.memory_space<vmem>>, %arg3: memref<1x32xf32, #tpu.memory_space<vmem>>, %arg4: memref<32x32xbf16, #tpu.memory_space<vmem>>, %arg5: memref<1x32xf32, #tpu.memory_space<vmem>>, %arg6: memref<4x32xbf16, #tpu.memory_space<vmem>>, %arg7: memref<4x1xf32, #tpu.memory_space<vmem>>, %arg8: memref<4x8xf32, #tpu.memory_space<vmem>>) attributes {dimension_semantics = [#tpu.dimension_semantics<parallel>], iteration_bounds = array<i64: 1>, scalar_prefetch = 0 : i64, scratch_operands = 0 : i64, tpu.core_type = #tpu.core_type<tc>, window_params = [{transform_indices = @transform_0, window_bounds = array<i64: 8, 16>}, {pipeline_mode = #tpu.pipeline_mode<synchronous>, transform_indices = @transform_1, window_bounds = array<i64: 16, 32>}, {pipeline_mode = #tpu.pipeline_mode<synchronous>, transform_indices = @transform_2, window_bounds = array<i64: 1, 32>}, {pipeline_mode = #tpu.pipeline_mode<synchronous>, transform_indices = @transform_3, window_bounds = array<i64: 32, 32>}, {pipeline_mode = #tpu.pipeline_mode<synchronous>, transform_indices = @transform_4, window_bounds = array<i64: 1, 32>}, {pipeline_mode = #tpu.pipeline_mode<synchronous>, transform_indices = @transform_5, window_bounds = array<i64: 4, 32>}, {pipeline_mode = #tpu.pipeline_mode<synchronous>, transform_indices = @transform_6, window_bounds = array<i64: 4, 1>}, {transform_indices = @transform_7, window_bounds = array<i64: 4, 8>}]} {
    %c0 = arith.constant 0 : index
    %c0_0 = arith.constant 0 : index
    %0 = vector.load %arg1[%c0, %c0_0] : memref<8x16xf32, #tpu.memory_space<vmem>>, vector<8x16xf32>
    %1 = arith.truncf %0 : vector<8x16xf32> to vector<8x16xbf16>
    %c0_1 = arith.constant 0 : index
    %c0_2 = arith.constant 0 : index
    %2 = vector.load %arg2[%c0_1, %c0_2] : memref<16x32xbf16, #tpu.memory_space<vmem>>, vector<16x32xbf16>
    %cst = arith.constant dense<0.000000e+00> : vector<8x32xf32>
    %3 = tpu.matmul %1, %2, %cst {dimension_numbers = #tpu.dot_dimension_numbers<[1], [0], [0], [1], [0, 0, 1, 1], [], []>} : vector<8x16xbf16>, vector<16x32xbf16>, vector<8x32xf32> -> vector<8x32xf32>
    %c0_3 = arith.constant 0 : index
    %c0_4 = arith.constant 0 : index
    %4 = vector.load %arg3[%c0_3, %c0_4] : memref<1x32xf32, #tpu.memory_space<vmem>>, vector<1x32xf32>
    %5 = vector.broadcast %4 : vector<1x32xf32> to vector<8x32xf32>
    %6 = arith.addf %3, %5 : vector<8x32xf32>
    %7 = math.tanh %6 : vector<8x32xf32>
    %8 = arith.truncf %7 : vector<8x32xf32> to vector<8x32xbf16>
    %c0_5 = arith.constant 0 : index
    %c0_6 = arith.constant 0 : index
    %9 = vector.load %arg4[%c0_5, %c0_6] : memref<32x32xbf16, #tpu.memory_space<vmem>>, vector<32x32xbf16>
    %cst_7 = arith.constant dense<0.000000e+00> : vector<8x32xf32>
    %10 = tpu.matmul %8, %9, %cst_7 {dimension_numbers = #tpu.dot_dimension_numbers<[1], [0], [0], [1], [0, 0, 1, 1], [], []>} : vector<8x32xbf16>, vector<32x32xbf16>, vector<8x32xf32> -> vector<8x32xf32>
    %c0_8 = arith.constant 0 : index
    %c0_9 = arith.constant 0 : index
    %11 = vector.load %arg5[%c0_8, %c0_9] : memref<1x32xf32, #tpu.memory_space<vmem>>, vector<1x32xf32>
    %12 = vector.broadcast %11 : vector<1x32xf32> to vector<8x32xf32>
    %13 = arith.addf %10, %12 : vector<8x32xf32>
    %14 = math.tanh %13 : vector<8x32xf32>
    %c0_10 = arith.constant 0 : index
    %c0_11 = arith.constant 0 : index
    %15 = vector.load %arg6[%c0_10, %c0_11] : memref<4x32xbf16, #tpu.memory_space<vmem>>, vector<4x32xbf16>
    %16 = arith.truncf %14 : vector<8x32xf32> to vector<8x32xbf16>
    %cst_12 = arith.constant dense<0.000000e+00> : vector<4x8xf32>
    %17 = tpu.matmul %15, %16, %cst_12 {dimension_numbers = #tpu.dot_dimension_numbers<[1], [1], [0], [0], [0, 0, 1, 0], [], []>} : vector<4x32xbf16>, vector<8x32xbf16>, vector<4x8xf32> -> vector<4x8xf32>
    %c0_13 = arith.constant 0 : index
    %c0_14 = arith.constant 0 : index
    %18 = vector.load %arg7[%c0_13, %c0_14] : memref<4x1xf32, #tpu.memory_space<vmem>>, vector<4x1xf32>
    %19 = vector.broadcast %18 : vector<4x1xf32> to vector<4x8xf32>
    %20 = arith.addf %17, %19 : vector<4x8xf32>
    %c0_15 = arith.constant 0 : index
    %c0_16 = arith.constant 0 : index
    %21 = vector.load %arg8[%c0_15, %c0_16] : memref<4x8xf32, #tpu.memory_space<vmem>>, vector<4x8xf32>
    tpu.vector_store %arg8[%c0_15, %c0_16], %20 {strides = array<i32>} : memref<4x8xf32, #tpu.memory_space<vmem>>, vector<4x8xf32>,
    return
  }
  func.func @transform_0(%arg0: i32) -> (i32, i32) {
    %c0_i32 = arith.constant 0 : i32
    %c0_i32_0 = arith.constant 0 : i32
    return %arg0, %c0_i32 : i32, i32
  }
  func.func @transform_1(%arg0: i32) -> (i32, i32) {
    %c0_i32 = arith.constant 0 : i32
    %c0_i32_0 = arith.constant 0 : i32
    %c0_i32_1 = arith.constant 0 : i32
    return %c0_i32, %c0_i32_0 : i32, i32
  }
  func.func @transform_2(%arg0: i32) -> (i32, i32) {
    %c0_i32 = arith.constant 0 : i32
    %c0_i32_0 = arith.constant 0 : i32
    %c0_i32_1 = arith.constant 0 : i32
    return %c0_i32, %c0_i32_0 : i32, i32
  }
  func.func @transform_3(%arg0: i32) -> (i32, i32) {
    %c0_i32 = arith.constant 0 : i32
    %c0_i32_0 = arith.constant 0 : i32
    %c0_i32_1 = arith.constant 0 : i32
    return %c0_i32, %c0_i32_0 : i32, i32
  }
  func.func @transform_4(%arg0: i32) -> (i32, i32) {
    %c0_i32 = arith.constant 0 : i32
    %c0_i32_0 = arith.constant 0 : i32
    %c0_i32_1 = arith.constant 0 : i32
    return %c0_i32, %c0_i32_0 : i32, i32
  }
  func.func @transform_5(%arg0: i32) -> (i32, i32) {
    %c0_i32 = arith.constant 0 : i32
    %c0_i32_0 = arith.constant 0 : i32
    %c0_i32_1 = arith.constant 0 : i32
    return %c0_i32, %c0_i32_0 : i32, i32
  }
  func.func @transform_6(%arg0: i32) -> (i32, i32) {
    %c0_i32 = arith.constant 0 : i32
    %c0_i32_0 = arith.constant 0 : i32
    %c0_i32_1 = arith.constant 0 : i32
    return %c0_i32, %c0_i32_0 : i32, i32
  }
  func.func @transform_7(%arg0: i32) -> (i32, i32) {
    %c0_i32 = arith.constant 0 : i32
    %c0_i32_0 = arith.constant 0 : i32
    return %c0_i32, %arg0 : i32, i32
  }
}

</mosaic_0001>

<bundles_post_ra>
// kernel: mlp_policy_forward.1
= control target key start
LH: loop header
LB: loop body
LE: loop exit
PB: predicated region body
PF: predicated region fallthrough
CT: control target
= control target key end

     0   :  { %s269_s0 = inlined_call_operand.vmem [shape: f32[8,16], index: 0, kind: input, shape index: {}]   ;;  %s270_s1 = inlined_call_operand.vmem [shape: bf16[16,32], index: 1, kind: input, shape index: {}]   ;;  %s271_s2 = inlined_call_operand.vmem [shape: f32[1,32], index: 2, kind: input, shape index: {}]   ;;  %s272_s3 = inlined_call_operand.vmem [shape: bf16[32,32], index: 3, kind: input, shape index: {}]   ;;  %s273_s4 = inlined_call_operand.vmem [shape: f32[1,32], index: 4, kind: input, shape index: {}]   ;;  %s274_s5 = inlined_call_operand.vmem [shape: bf16[4,32], index: 5, kind: input, shape index: {}]   ;;  %s275_s6 = inlined_call_operand.vmem [shape: f32[4,1], index: 6, kind: input, shape index: {}]   ;;  %s276_s7 = inlined_call_operand.hbm [shape: f32[4,8], index: 7, kind: output, shape index: {}]  }
   0x1   :  { %v159_v0 = vld [vmem:[%s270_s1] sm:$0xff] }
   0x2   :  { %v28_v1 = vld [vmem:[%s269_s0] sm:$0xff] }
   0x3   :  { %v29_v2 = vpack.c.bf16 %v28_v1, %v28_v1 }
   0x4   :  { %12 = vsyncpa [#allocation3], 0  ;;  %53 = vmatpush.bf16.msra.mxu0 %v159_v0  ;;  %vm42_vm0 = vcmask 130048   ;;  %v161_v3 = vld [vmem:[%s272_s3 + $0x8] sm:$0xff]  ;;  %v160_v4 = vld [vmem:[%s272_s3] sm:$0xff]  ;;  %vm81_vm1 = vcmask 261120  }
   0x5   :  { %91 = vmatpush.bf16.msra.mxu1 %v161_v3  ;;  %v165_v5 = vld [vmem:[%s271_s2] ss:$0 sm:$0xff]  ;;  %v197_v12 = vmov 0   ;;  %s135_s15 = sshll.u32 %s276_s7, 4  ;;  %vm126_vm2 = vcmask 60416   ;;  %s136_s15 = int_to_ptr.hbm [resolvable:$true] %s135_s15 }
   0x6   :  { %v101_v11 = vld [vmem:[%s275_s6] sm:$0xf]  ;;  %164 = vset.pattern.permute.xlu0 %v197_v12  ;;  %s198_s6 = smov [#allocation2]  }
   0x7   :  { %148 = vmatmul.msk.bf16.vlgmr.msra.gmra.mxu0 %vm42_vm0, %v29_v2  ;;  %104 = vperm.xlu0 %164, %v101_v11   ;;  %v166_v13 = vld [vmem:[%s273_s4] ss:$0 sm:$0xff]  ;;  %s133_s13 = sshll.u32 %s198_s6, 4  ;;  %s134_s13 = int_to_ptr.vmem [resolvable:$true] %s133_s13 }
   0x8   :  { %v99_v20 = vld [vmem:[%s274_s5] sm:$0x3] }
   0x9   :  { %92 = vmatpush.bf16.msra.mxu1 %v160_v4 }
  0x79   :  { %v105_v21 = vpop.permute.xlu0 %104 }
  0x84   :  { %v55_v6 = vpop.f32.mrf.mxu0 }
  0x85   :  { %v56_v7 = vadd.f32 %v165_v5, %v55_v6 }
  0x87   :  { %167 = vtanh.f32 %v56_v7 }
  0x8c   :  { %v57_v8 = vpop.f32.mrf.mxu0 }
  0x8d   :  { %v168_v9 = vpop.eup %167 }
  0x8e   :  { %v60_v10 = vpack.c.bf16 %v168_v9, %v168_v9 }
  0x90   :  { %157 = vmatmul.msk.bf16.vlgmr.msra.gmra.mxu1 %vm81_vm1, %v60_v10 }
 0x10d   :  { %v94_v14 = vpop.f32.mrf.mxu1 }
 0x10e   :  { %v95_v15 = vadd.f32 %v166_v13, %v94_v14 }
 0x110   :  { %169 = vtanh.f32 %v95_v15 }
 0x115   :  { %v96_v16 = vpop.f32.mrf.mxu1 }
 0x116   :  { %v170_v17 = vpop.eup %169 }
 0x117   :  { %v100_v18 = vpack.c.bf16 %v170_v17, %v170_v17 }
 0x119   :  { %v111_v19 = vsel %vm81_vm1, %v100_v18, 0 }
 0x11a   :  { %120 = vmatpush.bf16.xpose.msra.mxu2 %v111_v19 }
 0x121   :  { %158 = vmatmul.msk.bf16.vlgmr.msra.gmra.mxu2 %vm81_vm1, %v99_v20 }
 0x1a4   :  { %v122_v22 = vpop.f32.mrf.mxu2 }
 0x1a5   :  { %v123_v23 = vadd.f32 %v122_v22, %v105_v21 }
 0x1a7   :  { %127 = vst.msk [vmem:[#allocation2] sm:$0xf] %vm126_vm2, %v123_v23 }
 0x1a8   :  { %138 = dma.vmem_to_hbm [thread:$0]  %s134_s13, 64, %s136_s15, [#allocation3]  }
 0x1ac   :  { %v124_v24 = vpop.f32.mrf.mxu2 }
 0x1ad   :  { %195 = dma.done.wait [#allocation3], 64  }
 0x1ae   :  { %196 = vsyncadd [#allocation3], 4294967232 }
 0x1af   :  { %143 = vsyncpa [#allocation3], 1 }

</bundles_post_ra>
